<compile_context>
chip_gen: v5e
topology: v5e:2x2
jax: 0.10.0
libtpu: 0.0.40
codegen_flags: <defaults>
</compile_context>

<pallas_src>
import math
from functools import partial

import jax
import jax.numpy as jnp
from jax.experimental import pallas as pl
from jax.experimental.pallas import tpu as pltpu


_LANES = 128
_MAX_TILE_ROWS = 1024      # rows of 128 lanes per level per grid step (512 KiB f32/level)
_NUM_SPLITS = 2            # leading "parallel" grid axis (both TCs on v7x)


def _cdiv(a, b):
    return -(-a // b)


def _round_up(x, m):
    return ((x + m - 1) // m) * m


# ---------------------------------------------------------------------------
# Pallas kernel: fused per-level binary-target BCE partial sums
# ---------------------------------------------------------------------------

def _bce_sums_kernel(*refs, num_levels):
    """refs = (pred_1, ..., pred_K, target, out, acc).

    pred_l : (TR, 128) probabilities for level l
    target : (TR, 128) binary target (shared across levels)
    out    : (1, K, 1) per-split sums of clamp(log q, -100)   (negated on the host)
    acc    : (K, 128)  VMEM scratch, per-lane partial sums
    """
    pred_refs = refs[:num_levels]
    t_ref = refs[num_levels]
    out_ref = refs[num_levels + 1]
    acc_ref = refs[num_levels + 2]

    j = pl.program_id(1)                      # reduction ("arbitrary") axis

    @pl.when(j == 0)
    def _():
        acc_ref[...] = jnp.zeros_like(acc_ref)

    # Binary targets (t in {0,1}) collapse BCE to a single log:
    #   q = t*p + (1-t)*(1-p) = (1-t) + p*(2t-1);   per-element loss = -max(log q, -100)
    # (the -100 clamp matches nn.BCELoss).  Shared target terms are hoisted out of the
    # static level loop; the negation is deferred to the host.
    t = t_ref[...].astype(jnp.float32)
    one_minus_t = 1.0 - t
    two_t_minus_one = 2.0 * t - 1.0

    for l in range(num_levels):               # static unroll over levels
        p = pred_refs[l][...].astype(jnp.float32)
        q = one_minus_t + p * two_t_minus_one
        clog = jnp.maximum(jnp.log(q), -100.0)
        # sublane-axis partial reduce (cheap), accumulate per-lane sums per level
        acc_ref[pl.ds(l, 1), :] += jnp.sum(clog, axis=0, keepdims=True)

    @pl.when(j == pl.num_programs(1) - 1)
    def _():
        # single cross-lane reduce + tiny store, once per split
        out_ref[...] = jnp.sum(acc_ref[...], axis=1, keepdims=True)[None, :, :]


# ---------------------------------------------------------------------------
# Pallas wrapper
# ---------------------------------------------------------------------------

@jax.jit
def _bce_level_sums(preds, target):
    """preds: tuple of K equally-shaped probability arrays; target: same-shaped binary
    array.  Returns (K,) f32: per-level SUM of BCELoss (with -100 clamp) over all
    elements (caller divides by the element count for the mean)."""
    num_levels = len(preds)
    p_elems = math.prod(target.shape)

    rows = _cdiv(p_elems, _LANES)
    tile_rows = min(_MAX_TILE_ROWS, _round_up(_cdiv(rows, _NUM_SPLITS), 8))
    tiles_per_split = _cdiv(rows, _NUM_SPLITS * tile_rows)
    # Prefer an exact tiling (no tail pad => no extra HBM copy) when the row count allows.
    if rows % (_NUM_SPLITS * tiles_per_split) == 0:
        exact = rows // (_NUM_SPLITS * tiles_per_split)
        if exact % 8 == 0:
            tile_rows = exact
    rows_pad = _NUM_SPLITS * tiles_per_split * tile_rows
    npad = rows_pad * _LANES - p_elems

    def to_slab(a):
        flat = a.reshape(-1)
        if npad:
            # Zero padding is exact: p=0, t=0 -> q = 1 -> log q = 0 contribution.
            flat = jnp.pad(flat, (0, npad))
        return flat.reshape(rows_pad, _LANES)

    slabs = [to_slab(p) for p in preds] + [to_slab(target)]

    in_spec = pl.BlockSpec((tile_rows, _LANES),
                           lambda c, j: (c * tiles_per_split + j, 0))

    out = pl.pallas_call(
        partial(_bce_sums_kernel, num_levels=num_levels),
        out_shape=jax.ShapeDtypeStruct((_NUM_SPLITS, num_levels, 1), jnp.float32),
        grid=(_NUM_SPLITS, tiles_per_split),
        in_specs=[in_spec] * (num_levels + 1),
        out_specs=pl.BlockSpec((1, num_levels, 1), lambda c, j: (c, 0, 0)),
        scratch_shapes=[pltpu.VMEM((num_levels, _LANES), jnp.float32)],
        compiler_params=pltpu.CompilerParams(
            dimension_semantics=("parallel", "arbitrary")),
    )(*slabs)

    # combine splits and undo the deferred negation
    return -jnp.sum(out[:, :, 0], axis=0)


# ---------------------------------------------------------------------------
# Host-side glue: nested_tensor_from_tensor_list equivalent (zero-pad + stack)
# ---------------------------------------------------------------------------

def nested_tensor_from_list(arr_list):
    """Pad a list of (C, H, W) arrays to a common shape and stack -> (N, C, Hmax, Wmax).
    Also returns the DETR-style padding mask (unused by the loss, matching the original)."""
    ndim = arr_list[0].ndim
    max_shape = tuple(max(int(a.shape[d]) for a in arr_list) for d in range(ndim))
    padded, pad_masks = [], []
    for a in arr_list:
        pads = [(0, max_shape[d] - int(a.shape[d])) for d in range(ndim)]
        padded.append(jnp.pad(a, pads))
        m = jnp.ones(max_shape[-2:], dtype=bool)
        m = m.at[: a.shape[-2], : a.shape[-1]].set(False)
        pad_masks.append(m)
    return jnp.stack(padded, axis=0), jnp.stack(pad_masks, axis=0)


# ---------------------------------------------------------------------------
# SetCriterion.forward
# ---------------------------------------------------------------------------

def set_criterion_forward(weight_dict, outputs, targets, compute_unused_edge_loss=False):
    num_levels = len(outputs) // 2

    masks = [t['masks'] for t in targets]
    target_masks, _mask_valid = nested_tensor_from_list(masks)          # (N, C, H, W)
    target_masks = target_masks.astype(outputs['pred_mask1'].dtype)

    preds_mask = tuple(outputs['pred_mask' + str(i)] for i in range(1, num_levels + 1))
    p_elems = math.prod(target_masks.shape)

    mask_sums = _bce_level_sums(preds_mask, target_masks)
    mask_means = mask_sums / p_elems            # size_average=True -> mean over elements

    if compute_unused_edge_loss:
        # Fidelity path only: the original computes an edge BCE per level and discards it.
        edges = [t['edges'] for t in targets]
        target_edges, _edge_valid = nested_tensor_from_list(edges)
        target_edges = target_edges.astype(outputs['pred_edge1'].dtype)
        preds_edge = tuple(outputs['pred_edge' + str(i)]
                           for i in range(1, num_levels + 1))
        edge_sums = _bce_level_sums(preds_edge, target_edges)
        _edge_losses = edge_sums / math.prod(target_edges.shape) * weight_dict['loss_edge']
        del _edge_losses                        # discarded, exactly like the original

    losses = {}
    for i in range(1, num_levels + 1):
        losses['bce_loss' + str(i)] = mask_means[i - 1] * weight_dict['loss_bce']
    return losses


# ---------------------------------------------------------------------------
# Main
# ---------------------------------------------------------------------------

if __name__ == "__main__":
    root = jax.random.PRNGKey(0)
    k_pred, k_tgt = jax.random.split(root)

    N, H, W = 2, 16, 16
    num_levels = 6                      # GETR head emits 6 mask / 6 edge predictions
    weight_dict = {'loss_bce': 5.0, 'loss_edge': 1.0}

    # Predictions are post-sigmoid probabilities, shape (N, 1, H, W) each.
    pks = jax.random.split(k_pred, 2 * num_levels)
    outputs = {}
    for i in range(1, num_levels + 1):
        outputs['pred_mask' + str(i)] = jax.nn.sigmoid(
            jax.random.normal(pks[2 * (i - 1)], (N, 1, H, W), jnp.float32))
        outputs['pred_edge' + str(i)] = jax.nn.sigmoid(
            jax.random.normal(pks[2 * (i - 1) + 1], (N, 1, H, W), jnp.float32))

    # Per-image binary targets, shape (1, H, W) each.
    tks = jax.random.split(k_tgt, 2 * N)
    targets = []
    for b in range(N):
        m = (jax.random.uniform(tks[2 * b], (1, H, W)) > 0.5).astype(jnp.float32)
        e = (jax.random.uniform(tks[2 * b + 1], (1, H, W)) > 0.8).astype(jnp.float32)
        targets.append({'masks': m, 'edges': e})

    losses = set_criterion_forward(weight_dict, outputs, targets)
    jax.block_until_ready(losses)

    # --- pure-JAX reference check (torch nn.BCELoss two-log form) -----------
    tm_ref = jnp.stack([t['masks'] for t in targets], axis=0)   # (N, 1, H, W)

    def ref_bce(p, t):
        lp = jnp.maximum(jnp.log(p), -100.0)
        l1p = jnp.maximum(jnp.log(1.0 - p), -100.0)
        return jnp.mean(-(t * lp + (1.0 - t) * l1p))

    expected_keys = {'bce_loss' + str(i) for i in range(1, num_levels + 1)}
    assert set(losses.keys()) == expected_keys
    for i in range(1, num_levels + 1):
        got = losses['bce_loss' + str(i)]
        want = ref_bce(outputs['pred_mask' + str(i)], tm_ref) * weight_dict['loss_bce']
        assert got.shape == ()
        assert bool(jnp.isfinite(got))
        assert abs(float(got) - float(want)) <= 1e-4 * max(1.0, abs(float(want)))

    print("KERNEL_OK")
</pallas_src>

<mosaic_0001>
module attributes {stable_mosaic.version = 11 : i64} {
  func.func @_bce_sums_kernel(%arg0: i32, %arg1: i32, %arg2: memref<8x128xf32, #tpu.memory_space<vmem>>, %arg3: memref<8x128xf32, #tpu.memory_space<vmem>>, %arg4: memref<8x128xf32, #tpu.memory_space<vmem>>, %arg5: memref<8x128xf32, #tpu.memory_space<vmem>>, %arg6: memref<8x128xf32, #tpu.memory_space<vmem>>, %arg7: memref<8x128xf32, #tpu.memory_space<vmem>>, %arg8: memref<8x128xf32, #tpu.memory_space<vmem>>, %arg9: memref<1x6x1xf32, #tpu.memory_space<vmem>>, %arg10: memref<6x128xf32, #tpu.memory_space<vmem>>) attributes {dimension_semantics = [#tpu.dimension_semantics<parallel>, #tpu.dimension_semantics<arbitrary>], iteration_bounds = array<i64: 2, 1>, scalar_prefetch = 0 : i64, scratch_operands = 1 : i64, tpu.core_type = #tpu.core_type<tc>, window_params = [{transform_indices = @transform_0, window_bounds = array<i64: 8, 128>}, {transform_indices = @transform_1, window_bounds = array<i64: 8, 128>}, {transform_indices = @transform_2, window_bounds = array<i64: 8, 128>}, {transform_indices = @transform_3, window_bounds = array<i64: 8, 128>}, {transform_indices = @transform_4, window_bounds = array<i64: 8, 128>}, {transform_indices = @transform_5, window_bounds = array<i64: 8, 128>}, {transform_indices = @transform_6, window_bounds = array<i64: 8, 128>}, {transform_indices = @transform_7, window_bounds = array<i64: 1, 6, 1>}]} {
    %c0_i32 = arith.constant 0 : i32
    %0 = arith.cmpi eq, %arg1, %c0_i32 : i32
    %1 = arith.extui %0 : i1 to i32
    %c0_i32_0 = arith.constant 0 : i32
    %2 = arith.cmpi ne, %1, %c0_i32_0 : i32
    scf.if %2 {
      %cst_49 = arith.constant 0.000000e+00 : f32
      %79 = vector.broadcast %cst_49 : f32 to vector<6x128xf32>
      %c0_50 = arith.constant 0 : index
      %c0_51 = arith.constant 0 : index
      %80 = vector.load %arg10[%c0_50, %c0_51] : memref<6x128xf32, #tpu.memory_space<vmem>>, vector<6x128xf32>
      tpu.vector_store %arg10[%c0_50, %c0_51], %79 {strides = array<i32>} : memref<6x128xf32, #tpu.memory_space<vmem>>, vector<6x128xf32>,
    } else {
    }
    %c0 = arith.constant 0 : index
    %c0_1 = arith.constant 0 : index
    %3 = vector.load %arg8[%c0, %c0_1] : memref<8x128xf32, #tpu.memory_space<vmem>>, vector<8x128xf32>
    %cst = arith.constant 1.000000e+00 : f32
    %4 = vector.broadcast %cst : f32 to vector<8x128xf32>
    %5 = arith.subf %4, %3 : vector<8x128xf32>
    %cst_2 = arith.constant 2.000000e+00 : f32
    %6 = vector.broadcast %cst_2 : f32 to vector<8x128xf32>
    %7 = arith.mulf %6, %3 : vector<8x128xf32>
    %cst_3 = arith.constant 1.000000e+00 : f32
    %8 = vector.broadcast %cst_3 : f32 to vector<8x128xf32>
    %9 = arith.subf %7, %8 : vector<8x128xf32>
    %c0_4 = arith.constant 0 : index
    %c0_5 = arith.constant 0 : index
    %10 = vector.load %arg2[%c0_4, %c0_5] : memref<8x128xf32, #tpu.memory_space<vmem>>, vector<8x128xf32>
    %11 = arith.mulf %10, %9 : vector<8x128xf32>
    %12 = arith.addf %5, %11 : vector<8x128xf32>
    %13 = math.log %12 : vector<8x128xf32>
    %cst_6 = arith.constant -1.000000e+02 : f32
    %14 = vector.broadcast %cst_6 : f32 to vector<8x128xf32>
    %15 = arith.maximumf %13, %14 : vector<8x128xf32>
    %c0_7 = arith.constant 0 : index
    %c0_8 = arith.constant 0 : index
    %16 = vector.load %arg10[%c0_7, %c0_8] : memref<6x128xf32, #tpu.memory_space<vmem>>, vector<1x128xf32>
    %cst_9 = arith.constant dense<0.000000e+00> : vector<128xf32>
    %17 = vector.multi_reduction <add>, %15, %cst_9 [0] : vector<8x128xf32> to vector<128xf32>
    %18 = vector.shape_cast %17 : vector<128xf32> to vector<1x128xf32>
    %19 = arith.addf %16, %18 : vector<1x128xf32>
    %c0_10 = arith.constant 0 : index
    %c0_11 = arith.constant 0 : index
    %20 = vector.load %arg10[%c0_10, %c0_11] : memref<6x128xf32, #tpu.memory_space<vmem>>, vector<1x128xf32>
    tpu.vector_store %arg10[%c0_10, %c0_11], %19 {strides = array<i32>} : memref<6x128xf32, #tpu.memory_space<vmem>>, vector<1x128xf32>,
    %c0_12 = arith.constant 0 : index
    %c0_13 = arith.constant 0 : index
    %21 = vector.load %arg3[%c0_12, %c0_13] : memref<8x128xf32, #tpu.memory_space<vmem>>, vector<8x128xf32>
    %22 = arith.mulf %21, %9 : vector<8x128xf32>
    %23 = arith.addf %5, %22 : vector<8x128xf32>
    %24 = math.log %23 : vector<8x128xf32>
    %cst_14 = arith.constant -1.000000e+02 : f32
    %25 = vector.broadcast %cst_14 : f32 to vector<8x128xf32>
    %26 = arith.maximumf %24, %25 : vector<8x128xf32>
    %c1 = arith.constant 1 : index
    %c0_15 = arith.constant 0 : index
    %27 = vector.load %arg10[%c1, %c0_15] : memref<6x128xf32, #tpu.memory_space<vmem>>, vector<1x128xf32>
    %cst_16 = arith.constant dense<0.000000e+00> : vector<128xf32>
    %28 = vector.multi_reduction <add>, %26, %cst_16 [0] : vector<8x128xf32> to vector<128xf32>
    %29 = vector.shape_cast %28 : vector<128xf32> to vector<1x128xf32>
    %30 = arith.addf %27, %29 : vector<1x128xf32>
    %c1_17 = arith.constant 1 : index
    %c0_18 = arith.constant 0 : index
    %31 = vector.load %arg10[%c1_17, %c0_18] : memref<6x128xf32, #tpu.memory_space<vmem>>, vector<1x128xf32>
    tpu.vector_store %arg10[%c1_17, %c0_18], %30 {strides = array<i32>} : memref<6x128xf32, #tpu.memory_space<vmem>>, vector<1x128xf32>,
    %c0_19 = arith.constant 0 : index
    %c0_20 = arith.constant 0 : index
    %32 = vector.load %arg4[%c0_19, %c0_20] : memref<8x128xf32, #tpu.memory_space<vmem>>, vector<8x128xf32>
    %33 = arith.mulf %32, %9 : vector<8x128xf32>
    %34 = arith.addf %5, %33 : vector<8x128xf32>
    %35 = math.log %34 : vector<8x128xf32>
    %cst_21 = arith.constant -1.000000e+02 : f32
    %36 = vector.broadcast %cst_21 : f32 to vector<8x128xf32>
    %37 = arith.maximumf %35, %36 : vector<8x128xf32>
    %c2 = arith.constant 2 : index
    %c0_22 = arith.constant 0 : index
    %38 = vector.load %arg10[%c2, %c0_22] : memref<6x128xf32, #tpu.memory_space<vmem>>, vector<1x128xf32>
    %cst_23 = arith.constant dense<0.000000e+00> : vector<128xf32>
    %39 = vector.multi_reduction <add>, %37, %cst_23 [0] : vector<8x128xf32> to vector<128xf32>
    %40 = vector.shape_cast %39 : vector<128xf32> to vector<1x128xf32>
    %41 = arith.addf %38, %40 : vector<1x128xf32>
    %c2_24 = arith.constant 2 : index
    %c0_25 = arith.constant 0 : index
    %42 = vector.load %arg10[%c2_24, %c0_25] : memref<6x128xf32, #tpu.memory_space<vmem>>, vector<1x128xf32>
    tpu.vector_store %arg10[%c2_24, %c0_25], %41 {strides = array<i32>} : memref<6x128xf32, #tpu.memory_space<vmem>>, vector<1x128xf32>,
    %c0_26 = arith.constant 0 : index
    %c0_27 = arith.constant 0 : index
    %43 = vector.load %arg5[%c0_26, %c0_27] : memref<8x128xf32, #tpu.memory_space<vmem>>, vector<8x128xf32>
    %44 = arith.mulf %43, %9 : vector<8x128xf32>
    %45 = arith.addf %5, %44 : vector<8x128xf32>
    %46 = math.log %45 : vector<8x128xf32>
    %cst_28 = arith.constant -1.000000e+02 : f32
    %47 = vector.broadcast %cst_28 : f32 to vector<8x128xf32>
    %48 = arith.maximumf %46, %47 : vector<8x128xf32>
    %c3 = arith.constant 3 : index
    %c0_29 = arith.constant 0 : index
    %49 = vector.load %arg10[%c3, %c0_29] : memref<6x128xf32, #tpu.memory_space<vmem>>, vector<1x128xf32>
    %cst_30 = arith.constant dense<0.000000e+00> : vector<128xf32>
    %50 = vector.multi_reduction <add>, %48, %cst_30 [0] : vector<8x128xf32> to vector<128xf32>
    %51 = vector.shape_cast %50 : vector<128xf32> to vector<1x128xf32>
    %52 = arith.addf %49, %51 : vector<1x128xf32>
    %c3_31 = arith.constant 3 : index
    %c0_32 = arith.constant 0 : index
    %53 = vector.load %arg10[%c3_31, %c0_32] : memref<6x128xf32, #tpu.memory_space<vmem>>, vector<1x128xf32>
    tpu.vector_store %arg10[%c3_31, %c0_32], %52 {strides = array<i32>} : memref<6x128xf32, #tpu.memory_space<vmem>>, vector<1x128xf32>,
    %c0_33 = arith.constant 0 : index
    %c0_34 = arith.constant 0 : index
    %54 = vector.load %arg6[%c0_33, %c0_34] : memref<8x128xf32, #tpu.memory_space<vmem>>, vector<8x128xf32>
    %55 = arith.mulf %54, %9 : vector<8x128xf32>
    %56 = arith.addf %5, %55 : vector<8x128xf32>
    %57 = math.log %56 : vector<8x128xf32>
    %cst_35 = arith.constant -1.000000e+02 : f32
    %58 = vector.broadcast %cst_35 : f32 to vector<8x128xf32>
    %59 = arith.maximumf %57, %58 : vector<8x128xf32>
    %c4 = arith.constant 4 : index
    %c0_36 = arith.constant 0 : index
    %60 = vector.load %arg10[%c4, %c0_36] : memref<6x128xf32, #tpu.memory_space<vmem>>, vector<1x128xf32>
    %cst_37 = arith.constant dense<0.000000e+00> : vector<128xf32>
    %61 = vector.multi_reduction <add>, %59, %cst_37 [0] : vector<8x128xf32> to vector<128xf32>
    %62 = vector.shape_cast %61 : vector<128xf32> to vector<1x128xf32>
    %63 = arith.addf %60, %62 : vector<1x128xf32>
    %c4_38 = arith.constant 4 : index
    %c0_39 = arith.constant 0 : index
    %64 = vector.load %arg10[%c4_38, %c0_39] : memref<6x128xf32, #tpu.memory_space<vmem>>, vector<1x128xf32>
    tpu.vector_store %arg10[%c4_38, %c0_39], %63 {strides = array<i32>} : memref<6x128xf32, #tpu.memory_space<vmem>>, vector<1x128xf32>,
    %c0_40 = arith.constant 0 : index
    %c0_41 = arith.constant 0 : index
    %65 = vector.load %arg7[%c0_40, %c0_41] : memref<8x128xf32, #tpu.memory_space<vmem>>, vector<8x128xf32>
    %66 = arith.mulf %65, %9 : vector<8x128xf32>
    %67 = arith.addf %5, %66 : vector<8x128xf32>
    %68 = math.log %67 : vector<8x128xf32>
    %cst_42 = arith.constant -1.000000e+02 : f32
    %69 = vector.broadcast %cst_42 : f32 to vector<8x128xf32>
    %70 = arith.maximumf %68, %69 : vector<8x128xf32>
    %c5 = arith.constant 5 : index
    %c0_43 = arith.constant 0 : index
    %71 = vector.load %arg10[%c5, %c0_43] : memref<6x128xf32, #tpu.memory_space<vmem>>, vector<1x128xf32>
    %cst_44 = arith.constant dense<0.000000e+00> : vector<128xf32>
    %72 = vector.multi_reduction <add>, %70, %cst_44 [0] : vector<8x128xf32> to vector<128xf32>
    %73 = vector.shape_cast %72 : vector<128xf32> to vector<1x128xf32>
    %74 = arith.addf %71, %73 : vector<1x128xf32>
    %c5_45 = arith.constant 5 : index
    %c0_46 = arith.constant 0 : index
    %75 = vector.load %arg10[%c5_45, %c0_46] : memref<6x128xf32, #tpu.memory_space<vmem>>, vector<1x128xf32>
    tpu.vector_store %arg10[%c5_45, %c0_46], %74 {strides = array<i32>} : memref<6x128xf32, #tpu.memory_space<vmem>>, vector<1x128xf32>,
    %c0_i32_47 = arith.constant 0 : i32
    %76 = arith.cmpi eq, %arg1, %c0_i32_47 : i32
    %77 = arith.extui %76 : i1 to i32
    %c0_i32_48 = arith.constant 0 : i32
    %78 = arith.cmpi ne, %77, %c0_i32_48 : i32
    scf.if %78 {
      %c0_49 = arith.constant 0 : index
      %c0_50 = arith.constant 0 : index
      %79 = vector.load %arg10[%c0_49, %c0_50] : memref<6x128xf32, #tpu.memory_space<vmem>>, vector<6x128xf32>
      %cst_51 = arith.constant dense<0.000000e+00> : vector<6xf32>
      %80 = vector.multi_reduction <add>, %79, %cst_51 [1] : vector<6x128xf32> to vector<6xf32>
      %81 = vector.shape_cast %80 : vector<6xf32> to vector<6x1xf32>
      %82 = vector.shape_cast %81 : vector<6x1xf32> to vector<1x6x1xf32>
      %c0_52 = arith.constant 0 : index
      %c0_53 = arith.constant 0 : index
      %c0_54 = arith.constant 0 : index
      %83 = vector.load %arg9[%c0_52, %c0_53, %c0_54] : memref<1x6x1xf32, #tpu.memory_space<vmem>>, vector<1x6x1xf32>
      tpu.vector_store %arg9[%c0_52, %c0_53, %c0_54], %82 {strides = array<i32>} : memref<1x6x1xf32, #tpu.memory_space<vmem>>, vector<1x6x1xf32>,
    } else {
    }
    return
  }
  func.func @transform_0(%arg0: i32, %arg1: i32) -> (i32, i32) {
    %c1_i32 = arith.constant 1 : i32
    %0 = arith.muli %arg0, %c1_i32 : i32
    %1 = arith.addi %0, %arg1 : i32
    %c0_i32 = arith.constant 0 : i32
    %c0_i32_0 = arith.constant 0 : i32
    return %1, %c0_i32 : i32, i32
  }
  func.func @transform_1(%arg0: i32, %arg1: i32) -> (i32, i32) {
    %c1_i32 = arith.constant 1 : i32
    %0 = arith.muli %arg0, %c1_i32 : i32
    %1 = arith.addi %0, %arg1 : i32
    %c0_i32 = arith.constant 0 : i32
    %c0_i32_0 = arith.constant 0 : i32
    return %1, %c0_i32 : i32, i32
  }
  func.func @transform_2(%arg0: i32, %arg1: i32) -> (i32, i32) {
    %c1_i32 = arith.constant 1 : i32
    %0 = arith.muli %arg0, %c1_i32 : i32
    %1 = arith.addi %0, %arg1 : i32
    %c0_i32 = arith.constant 0 : i32
    %c0_i32_0 = arith.constant 0 : i32
    return %1, %c0_i32 : i32, i32
  }
  func.func @transform_3(%arg0: i32, %arg1: i32) -> (i32, i32) {
    %c1_i32 = arith.constant 1 : i32
    %0 = arith.muli %arg0, %c1_i32 : i32
    %1 = arith.addi %0, %arg1 : i32
    %c0_i32 = arith.constant 0 : i32
    %c0_i32_0 = arith.constant 0 : i32
    return %1, %c0_i32 : i32, i32
  }
  func.func @transform_4(%arg0: i32, %arg1: i32) -> (i32, i32) {
    %c1_i32 = arith.constant 1 : i32
    %0 = arith.muli %arg0, %c1_i32 : i32
    %1 = arith.addi %0, %arg1 : i32
    %c0_i32 = arith.constant 0 : i32
    %c0_i32_0 = arith.constant 0 : i32
    return %1, %c0_i32 : i32, i32
  }
  func.func @transform_5(%arg0: i32, %arg1: i32) -> (i32, i32) {
    %c1_i32 = arith.constant 1 : i32
    %0 = arith.muli %arg0, %c1_i32 : i32
    %1 = arith.addi %0, %arg1 : i32
    %c0_i32 = arith.constant 0 : i32
    %c0_i32_0 = arith.constant 0 : i32
    return %1, %c0_i32 : i32, i32
  }
  func.func @transform_6(%arg0: i32, %arg1: i32) -> (i32, i32) {
    %c1_i32 = arith.constant 1 : i32
    %0 = arith.muli %arg0, %c1_i32 : i32
    %1 = arith.addi %0, %arg1 : i32
    %c0_i32 = arith.constant 0 : i32
    %c0_i32_0 = arith.constant 0 : i32
    return %1, %c0_i32 : i32, i32
  }
  func.func @transform_7(%arg0: i32, %arg1: i32) -> (i32, i32, i32) {
    %c0_i32 = arith.constant 0 : i32
    %c0_i32_0 = arith.constant 0 : i32
    %c0_i32_1 = arith.constant 0 : i32
    return %arg0, %c0_i32, %c0_i32_0 : i32, i32, i32
  }
}

</mosaic_0001>

<bundles_post_ra>
// kernel: neg.1
= control target key start
LH: loop header
LB: loop body
LE: loop exit
PB: predicated region body
PF: predicated region fallthrough
CT: control target
= control target key end

     0   :  { %2 = vsyncpa [#allocation1], 0  ;;  %s48_s9 = smov [#allocation0]   ;;  %s65_s0 = inlined_call_operand.vmem [shape: f32[6], index: 0, kind: input, shape index: {}]   ;;  %s66_s1 = inlined_call_operand.hbm [shape: f32[6], index: 1, kind: output, shape index: {}]  }
   0x1   :  { %v3_v0 = vld [vmem:[%s65_s0] sm:$0x1]  ;;  %s14_s1 = sshll.u32 %s66_s1, 4  ;;  %s12_s10 = sshll.u32 %s48_s9, 4  ;;  %s15_s1 = int_to_ptr.hbm [resolvable:$true] %s14_s1  ;;  %s13_s10 = int_to_ptr.vmem [resolvable:$true] %s12_s10 }
   0x2   :  { %v6_v1 = vxor.u32 2147483648, %v3_v0 }
   0x4   :  { %8 = vst [vmem:[#allocation0] sm:$0x1] %v6_v1 }
   0x5   :  { %17 = dma.vmem_to_hbm [thread:$0]  %s13_s10, 16, %s15_s1, [#allocation1]  }
   0x6   :  { %46 = dma.done.wait [#allocation1], 16  }
   0x7   :  { %47 = vsyncadd [#allocation1], 4294967280 }
   0x8   :  { %20 = vsyncpa [#allocation1], 1 }

// kernel: _bce_level_sums.1
= control target key start
LH: loop header
LB: loop body
LE: loop exit
PB: predicated region body
PF: predicated region fallthrough
CT: control target
= control target key end

     0   :  { %s797_s24 = smov 0   ;;  %s799_s25 = smov 0   ;;  %s858_s0 = inlined_call_operand.vmem [shape: f32[16,128], index: 0, kind: input, shape index: {}]   ;;  %s859_s1 = inlined_call_operand.vmem [shape: f32[16,128], index: 1, kind: input, shape index: {}]   ;;  %s860_s2 = inlined_call_operand.vmem [shape: f32[16,128], index: 2, kind: input, shape index: {}]   ;;  %s861_s3 = inlined_call_operand.vmem [shape: f32[16,128], index: 3, kind: input, shape index: {}]   ;;  %s862_s4 = inlined_call_operand.vmem [shape: f32[16,128], index: 4, kind: input, shape index: {}]   ;;  %s863_s5 = inlined_call_operand.vmem [shape: f32[16,128], index: 5, kind: input, shape index: {}]   ;;  %s864_s6 = inlined_call_operand.vmem [shape: f32[16,128], index: 6, kind: input, shape index: {}]   ;;  %s865_s7 = inlined_call_operand.vmem [shape: f32[2,6,1], index: 7, kind: output, shape index: {}]  }
   0x1   :  { %s801_s26 = smov 0  }
   0x2 LB: > { %s29_s27 = sadd.s32 1, %s750_s25  ;;  %p683_p0 = scmp.ge.s32.totalorder %s754_s26, 1  ;;  %s754_s26 = sphi %s801_s26, %s17_s26   ;;  %s750_s25 = sphi %s799_s25, %s867_s25   ;;  %s746_s24 = sphi %s797_s24, %s866_s24  }
   0x3   : > { %p31_p1 = scmp.ge.s32.totalorder %s29_s27, 2  ;;  %p330_p2 = scmp.lt.s32.totalorder %s754_s26, 3 }
   0x5   : > { %s869_s27 = smov (%p31_p1, %s29_s27), 0  ;;  %p331_p3 = pnand %p683_p0, %p330_p2 }
   0x6   : > { %p392_p4 = scmp.lt.s32.totalorder (!%p331_p3), %s746_s24, 1 }
   0x7   : > { %334 = sbr.rel (%p331_p3) target bundleno = 182 (0xb6), region = 48 }
   0xc   : > { %v756_v0 = vmov 0.0   ;;  %s871_s24 = smov (!%p392_p4, %s746_s24), 1  ;;  %vm540_vm0 = vcmask 1045504   ;;  %vm544_vm1 = vcmask 5120  }
   0xd   : > { %441 = vst [vmem:[#allocation2] sm:$0x3f] %v756_v0  ;;  %s815_s28 = sshll.u32 %s871_s24, 3 }
   0xe   : > { %s395_s8 = scalar_lea.vmem %s858_s0, %s815_s28  ;;  %s401_s11 = scalar_lea.vmem %s859_s1, %s815_s28 }
   0xf   : > { %s407_s14 = scalar_lea.vmem %s860_s2, %s815_s28  ;;  %s413_s17 = scalar_lea.vmem %s861_s3, %s815_s28  ;;  %v446_v3 = vld [vmem:[%s395_s8] sm:$0xff] }
  0x10   : > { %s431_s20 = scalar_lea.vmem %s864_s6, %s815_s28  ;;  %s419_s23 = scalar_lea.vmem %s862_s4, %s815_s28  ;;  %v461_v4 = vld [vmem:[%s401_s11] sm:$0xff] }
  0x11   : > { %s425_s30 = scalar_lea.vmem %s863_s5, %s815_s28  ;;  %v442_v1 = vld [vmem:[%s431_s20] sm:$0xff]  ;;  %s436_s10 = scalar_lea.vmem %s865_s7, %s815_s28 }
  0x12   : > { %v444_v2 = vmul.f32 2.0, %v442_v1  ;;  %v476_v5 = vld [vmem:[%s407_s14] sm:$0xff]  ;;  %v443_v7 = vsub.f32 1.0, %v442_v1 }
  0x13   : > { %v491_v6 = vld [vmem:[%s413_s17] sm:$0xff] }
  0x14   : > { %v692_v8 = vadd.f32 -1.0, %v444_v2  ;;  %v506_v9 = vld [vmem:[%s419_s23] sm:$0xff] }
  0x15   : > { %v521_v10 = vld [vmem:[%s425_s30] sm:$0xff] }
  0x16   : > { %v447_v11 = vmul.f32 %v692_v8, %v446_v3  ;;  %v462_v12 = vmul.f32 %v692_v8, %v461_v4  ;;  %v477_v13 = vmul.f32 %v692_v8, %v476_v5  ;;  %v492_v14 = vmul.f32 %v692_v8, %v491_v6  ;;  %v452_v62 = vld [vmem:[#allocation2] sm:$0x1]  ;;  %v467_v3 = vld [vmem:[#allocation2 + $0x1] sm:$0x1] }
  0x17   : > { %v507_v15 = vmul.f32 %v692_v8, %v506_v9  ;;  %v522_v16 = vmul.f32 %v692_v8, %v521_v10 }
  0x18   : > { %v448_v17 = vadd.f32 %v447_v11, %v443_v7  ;;  %v463_v18 = vadd.f32 %v462_v12, %v443_v7  ;;  %v478_v19 = vadd.f32 %v477_v13, %v443_v7  ;;  %v493_v20 = vadd.f32 %v492_v14, %v443_v7  ;;  %v497_v12 = vld [vmem:[#allocation2 + $0x3] sm:$0x1] }
  0x19   : > { %v508_v21 = vadd.f32 %v507_v15, %v443_v7  ;;  %v523_v22 = vadd.f32 %v522_v16, %v443_v7  ;;  %v482_v7 = vld [vmem:[#allocation2 + $0x2] sm:$0x1]  ;;  %v512_v16 = vld [vmem:[#allocation2 + $0x4] sm:$0x1] }
  0x1a   : > { %720 = vlog2.f32 %v448_v17 }
  0x1b   : > { %722 = vlog2.f32 %v463_v18 }
  0x1c   : > { %724 = vlog2.f32 %v478_v19 }
  0x1d   : > { %726 = vlog2.f32 %v493_v20  ;;  %v527_v20 = vld [vmem:[#allocation2 + $0x5] sm:$0x1] }
  0x1e   : > { %728 = vlog2.f32 %v508_v21 }
  0x1f   : > { %730 = vlog2.f32 %v523_v22 }
  0x20   : > { %v721_v23 = vpop.eup %720 }
  0x21   : > { %v723_v24 = vpop.eup %722  ;;  %v450_v25 = vmul.f32 0.6931472, %v721_v23 }
  0x22   : > { %v725_v26 = vpop.eup %724  ;;  %v465_v27 = vmul.f32 0.6931472, %v723_v24 }
  0x23   : > { %v727_v28 = vpop.eup %726  ;;  %v451_v29 = vmax.f32 %v450_v25, -100.0  ;;  %v480_v30 = vmul.f32 0.6931472, %v725_v26 }
  0x24   : > { %v729_v31 = vpop.eup %728  ;;  %v466_v32 = vmax.f32 %v465_v27, -100.0  ;;  %v495_v33 = vmul.f32 0.6931472, %v727_v28 }
  0x25   : > { %v731_v34 = vpop.eup %730  ;;  %v453_v35 = vrot.slane %v451_v29, 4  ;;  %v481_v36 = vmax.f32 %v480_v30, -100.0  ;;  %v510_v37 = vmul.f32 0.6931472, %v729_v31 }
  0x26   : > { %v468_v38 = vrot.slane %v466_v32, 4  ;;  %v496_v39 = vmax.f32 %v495_v33, -100.0  ;;  %v525_v40 = vmul.f32 0.6931472, %v731_v34 }
  0x27   : > { %v454_v41 = vadd.f32 %v453_v35, %v451_v29  ;;  %v483_v42 = vrot.slane %v481_v36, 4  ;;  %v511_v43 = vmax.f32 %v510_v37, -100.0 }
  0x28   : > { %v469_v44 = vadd.f32 %v468_v38, %v466_v32  ;;  %v498_v45 = vrot.slane %v496_v39, 4  ;;  %v526_v46 = vmax.f32 %v525_v40, -100.0 }
  0x29   : > { %v455_v47 = vrot.slane %v454_v41, 2  ;;  %v484_v48 = vadd.f32 %v483_v42, %v481_v36  ;;  %v513_v49 = vrot.slane %v511_v43, 4 }
  0x2a   : > { %v470_v50 = vrot.slane %v469_v44, 2  ;;  %v499_v51 = vadd.f32 %v498_v45, %v496_v39  ;;  %v528_v52 = vrot.slane %v526_v46, 4 }
  0x2b   : > { %v456_v53 = vadd.f32 %v455_v47, %v454_v41  ;;  %v485_v54 = vrot.slane %v484_v48, 2  ;;  %v514_v55 = vadd.f32 %v513_v49, %v511_v43 }
  0x2c   : > { %v471_v56 = vadd.f32 %v470_v50, %v469_v44  ;;  %v500_v57 = vrot.slane %v499_v51, 2  ;;  %v529_v58 = vadd.f32 %v528_v52, %v526_v46 }
  0x2d   : > { %v457_v59 = vrot.slane %v456_v53, 1  ;;  %v486_v60 = vadd.f32 %v485_v54, %v484_v48  ;;  %v515_v61 = vrot.slane %v514_v55, 2 }
  0x2e   : > { %v472_v63 = vrot.slane %v471_v56, 1  ;;  %v501_v0 = vadd.f32 %v500_v57, %v499_v51  ;;  %v530_v1 = vrot.slane %v529_v58, 2 }
  0x2f   : > { %v458_v2 = vadd.f32 %v457_v59, %v456_v53  ;;  %v487_v4 = vrot.slane %v486_v60, 1  ;;  %v516_v5 = vadd.f32 %v515_v61, %v514_v55 }
  0x30   : > { %v473_v6 = vadd.f32 %v472_v63, %v471_v56  ;;  %v502_v8 = vrot.slane %v501_v0, 1  ;;  %v531_v9 = vadd.f32 %v530_v1, %v529_v58 }
  0x31   : > { %v459_v10 = vadd.f32 %v458_v2, %v452_v62  ;;  %v488_v11 = vadd.f32 %v487_v4, %v486_v60  ;;  %v517_v13 = vrot.slane %v516_v5, 1 }
  0x32   : > { %v474_v14 = vadd.f32 %v473_v6, %v467_v3  ;;  %v503_v15 = vadd.f32 %v502_v8, %v501_v0  ;;  %v532_v17 = vrot.slane %v531_v9, 1 }
  0x33   : > { %460 = vst [vmem:[#allocation2] sm:$0x1] %v459_v10  ;;  %v489_v18 = vadd.f32 %v488_v11, %v482_v7  ;;  %v518_v19 = vadd.f32 %v517_v13, %v516_v5 }
  0x34   : > { %475 = vst [vmem:[#allocation2 + $0x1] sm:$0x1] %v474_v14  ;;  %v504_v21 = vadd.f32 %v503_v15, %v497_v12  ;;  %v533_v22 = vadd.f32 %v532_v17, %v531_v9 }
  0x35   : > { %490 = vst [vmem:[#allocation2 + $0x2] sm:$0x1] %v489_v18  ;;  %v519_v23 = vadd.f32 %v518_v19, %v512_v16 }
  0x36   : > { %505 = vst [vmem:[#allocation2 + $0x3] sm:$0x1] %v504_v21  ;;  %v534_v24 = vadd.f32 %v533_v22, %v527_v20 }
  0x37   : > { %520 = vst [vmem:[#allocation2 + $0x4] sm:$0x1] %v519_v23 }
  0x38   : > { %535 = vst [vmem:[#allocation2 + $0x5] sm:$0x1] %v534_v24 }
  0x3f   : > { %v539_v25 = vld [vmem:[#allocation2] sm:$0x3f] }
  0x40   : > { %v541_v26 = vsel %vm540_vm0, %v539_v25, 0.0 }
  0x41   : > { %542 = vadd.xlane.f32.xlu0 %v541_v26 }
  0xb4   : > { %v543_v27 = vpop.xlane.xlu0 %542 }
  0xb5   : > { %545 = vst.msk [vmem:[%s436_s10] sm:$0x3f] %vm544_vm1, %v543_v27 }
  0xb6 PF: > { %s17_s26 = sadd.s32 1, %s754_s26   ;;  %s866_s24 = smov %s750_s25 }
  0xb7   : > { %p14_p5 = scmp.ge.s32.totalorder %s17_s26, 4   ;;  %s867_s25 = smov %s869_s27 }
  0xb9   :  { %16 = sbr.rel (!%p14_p5) target bundleno = 2 (0x2), region = 104 }

</bundles_post_ra>
